<compile_context>
chip_gen: v5e
topology: v5e:2x2
jax: 0.10.0
libtpu: 0.0.40
codegen_flags: <defaults>
</compile_context>

<pallas_src>
import functools

import jax
import jax.numpy as jnp
from jax.experimental import pallas as pl
from jax.experimental.pallas import tpu as pltpu


def _attention_kernel(g_ref, x_ref, wgT_ref, wxT_ref, bgx_ref, wpT_ref, bp_ref,
                      o_ref):
    # g_ref: (F_l, TM)   x_ref: (F_g, TM)   -- channel-major, lane-dense tiles
    g_tile = g_ref[...]
    x_tile = x_ref[...]

    # (F_int, F_l) @ (F_l, TM) -> (F_int, TM) ; BN already folded into weights.
    g1 = jnp.dot(wgT_ref[...], g_tile, preferred_element_type=jnp.float32)
    x1 = jnp.dot(wxT_ref[...], x_tile, preferred_element_type=jnp.float32)

    # Combined bias (b_g + b_x), shape (F_int, 1), broadcast over lanes.
    a = jnp.maximum(g1 + x1 + bgx_ref[...], 0.0)            # ReLU, (F_int, TM)

    # (1, F_int) @ (F_int, TM) -> (1, TM) ; lane-dense psi row.
    psi = jax.nn.sigmoid(
        jnp.dot(wpT_ref[...], a, preferred_element_type=jnp.float32)
        + bp_ref[...])

    # Broadcast psi over the channel (sublane) axis of x.
    o_ref[...] = (x_tile.astype(jnp.float32) * psi).astype(o_ref.dtype)


def attention_block_pallas(g3, x3, wgT, wxT, b_gx, wpT, bp, *, tm=2048):
    """g3: (N, F_l, HW), x3: (N, F_g, HW). Returns (N, F_g, HW)."""
    N, F_l, HW = g3.shape
    _, F_g, _ = x3.shape
    F_int = wgT.shape[0]

    # Clamp the spatial tile to the (128-aligned) spatial extent, then pad the
    # spatial axis so it divides evenly.  Padded columns produce garbage psi
    # but are multiplied with zero-padded x and sliced away by the wrapper.
    tm_eff = min(tm, pl.cdiv(HW, 128) * 128)
    hw_pad = pl.cdiv(HW, tm_eff) * tm_eff
    if hw_pad != HW:
        pad = ((0, 0), (0, 0), (0, hw_pad - HW))
        g3 = jnp.pad(g3, pad)
        x3 = jnp.pad(x3, pad)

    grid = (N, hw_pad // tm_eff)

    row_spec = lambda C: pl.BlockSpec((None, C, tm_eff), lambda n, j: (n, 0, j))
    full_spec = lambda shape: pl.BlockSpec(shape, lambda n, j: (0, 0))

    m_total = N * hw_pad
    cost = pl.CostEstimate(
        flops=2 * m_total * (F_l * F_int + F_g * F_int + F_int)
              + 4 * m_total * F_int + 2 * m_total * F_g,
        transcendentals=m_total,                       # sigmoid
        bytes_accessed=4 * m_total * (F_l + 2 * F_g),  # read g, x; write out
    )

    out = pl.pallas_call(
        _attention_kernel,
        out_shape=jax.ShapeDtypeStruct((N, F_g, hw_pad), x3.dtype),
        grid_spec=pltpu.PrefetchScalarGridSpec(
            num_scalar_prefetch=0,
            grid=grid,
            in_specs=[
                row_spec(F_l),                 # g tile  (F_l, TM)
                row_spec(F_g),                 # x tile  (F_g, TM)
                full_spec((F_int, F_l)),       # W_g^T  (BN-folded)
                full_spec((F_int, F_g)),       # W_x^T  (BN-folded)
                full_spec((F_int, 1)),         # b_g + b_x (combined)
                full_spec((1, F_int)),         # W_psi^T (BN-folded)
                full_spec((1, 1)),             # b_psi
            ],
            out_specs=row_spec(F_g),
        ),
        compiler_params=pltpu.CompilerParams(
            dimension_semantics=("parallel", "parallel")),
        cost_estimate=cost,
    )(g3, x3, wgT, wxT, b_gx, wpT, bp)

    if hw_pad != HW:
        out = out[:, :, :HW]
    return out


def _fold_bn(w, b, gamma, beta, mean, var, eps=1e-5):
    """Fold inference-mode BatchNorm into a 1x1-conv weight (Cin, Cout) / bias (Cout,)."""
    scale = gamma / jnp.sqrt(var + eps)
    return w * scale[None, :], (b - mean) * scale + beta


@functools.partial(jax.jit, static_argnames=())
def attention_block(g_nchw, x_nchw, params):
    """Full forward matching the PyTorch module. Inputs are NCHW."""
    N, F_l, H, W = g_nchw.shape
    _, F_g, _, _ = x_nchw.shape
    F_int = params["wg"].shape[1]

    # NCHW -> (N, C, H*W): a free reshape, no transpose / extra HBM pass.
    g3 = g_nchw.reshape(N, F_l, H * W)
    x3 = x_nchw.reshape(N, F_g, H * W)

    # Fold the BatchNorms into the conv weights/bias (glue, not hot path).
    wg, bg = _fold_bn(params["wg"], params["bg"], params["bn_g_gamma"],
                      params["bn_g_beta"], params["bn_g_mean"], params["bn_g_var"])
    wx, bx = _fold_bn(params["wx"], params["bx"], params["bn_x_gamma"],
                      params["bn_x_beta"], params["bn_x_mean"], params["bn_x_var"])
    wp, bp = _fold_bn(params["wp"], params["bp"], params["bn_p_gamma"],
                      params["bn_p_beta"], params["bn_p_mean"], params["bn_p_var"])

    # Transposed (Cout, Cin) weights for channel-major matmuls; combined bias.
    wgT = wg.T.astype(jnp.float32)                        # (F_int, F_l)
    wxT = wx.T.astype(jnp.float32)                        # (F_int, F_g)
    b_gx = (bg + bx).reshape(F_int, 1).astype(jnp.float32)
    wpT = wp.T.astype(jnp.float32)                        # (1, F_int)
    bp2 = bp.reshape(1, 1).astype(jnp.float32)

    out3 = attention_block_pallas(g3, x3, wgT, wxT, b_gx, wpT, bp2)

    # (N, F_g, H*W) -> NCHW: free reshape.
    return out3.reshape(N, F_g, H, W)


def _reference(g_nchw, x_nchw, params):
    """Pure-JAX reference for sanity checking."""
    def conv1x1(x, w, b):  # x: NCHW, w: (Cin, Cout)
        return jnp.einsum("nchw,cd->ndhw", x, w) + b[None, :, None, None]

    def bn(x, gamma, beta, mean, var, eps=1e-5):
        s = gamma / jnp.sqrt(var + eps)
        return x * s[None, :, None, None] + (beta - mean * s)[None, :, None, None]

    g1 = bn(conv1x1(g_nchw, params["wg"], params["bg"]),
            params["bn_g_gamma"], params["bn_g_beta"],
            params["bn_g_mean"], params["bn_g_var"])
    x1 = bn(conv1x1(x_nchw, params["wx"], params["bx"]),
            params["bn_x_gamma"], params["bn_x_beta"],
            params["bn_x_mean"], params["bn_x_var"])
    a = jax.nn.relu(g1 + x1)
    psi = jax.nn.sigmoid(bn(conv1x1(a, params["wp"], params["bp"]),
                            params["bn_p_gamma"], params["bn_p_beta"],
                            params["bn_p_mean"], params["bn_p_var"]))
    return x_nchw * psi


if __name__ == "__main__":
    # Small shapes consistent with the module: F_g = F_l = 4 channels, F_int = 8.
    N, F_g, F_l, F_int, H, W = 2, 4, 4, 8, 16, 16

    key = jax.random.PRNGKey(0)
    k = jax.random.split(key, 9)
    g = jax.random.normal(k[0], (N, F_l, H, W), dtype=jnp.float32)
    x = jax.random.normal(k[1], (N, F_g, H, W), dtype=jnp.float32)

    params = dict(
        # Conv1x1 weights stored as (Cin, Cout); biases (Cout,)
        wg=0.1 * jax.random.normal(k[2], (F_l, F_int), dtype=jnp.float32),
        bg=0.1 * jax.random.normal(k[3], (F_int,), dtype=jnp.float32),
        wx=0.1 * jax.random.normal(k[4], (F_g, F_int), dtype=jnp.float32),
        bx=0.1 * jax.random.normal(k[5], (F_int,), dtype=jnp.float32),
        wp=0.1 * jax.random.normal(k[6], (F_int, 1), dtype=jnp.float32),
        bp=0.1 * jax.random.normal(k[7], (1,), dtype=jnp.float32),
        # BatchNorm (inference-mode) parameters, deterministic init.
        bn_g_gamma=jnp.ones((F_int,), jnp.float32),
        bn_g_beta=jnp.zeros((F_int,), jnp.float32),
        bn_g_mean=jnp.zeros((F_int,), jnp.float32),
        bn_g_var=jnp.ones((F_int,), jnp.float32),
        bn_x_gamma=jnp.ones((F_int,), jnp.float32),
        bn_x_beta=jnp.zeros((F_int,), jnp.float32),
        bn_x_mean=jnp.zeros((F_int,), jnp.float32),
        bn_x_var=jnp.ones((F_int,), jnp.float32),
        bn_p_gamma=jnp.ones((1,), jnp.float32),
        bn_p_beta=jnp.zeros((1,), jnp.float32),
        bn_p_mean=jnp.zeros((1,), jnp.float32),
        bn_p_var=jnp.ones((1,), jnp.float32),
    )

    out = attention_block(g, x, params)
    out = jax.block_until_ready(out)

    ref = _reference(g, x, params)
    assert out.shape == (N, F_g, H, W)
    assert jnp.allclose(out, ref, atol=1e-5, rtol=1e-5), "mismatch vs reference"

    print("KERNEL_OK")
</pallas_src>

<mosaic_0001>
module attributes {stable_mosaic.version = 11 : i64} {
  func.func @_attention_kernel(%arg0: i32, %arg1: i32, %arg2: memref<1x4x256xf32, #tpu.memory_space<vmem>>, %arg3: memref<1x4x256xf32, #tpu.memory_space<vmem>>, %arg4: memref<8x4xf32, #tpu.memory_space<vmem>>, %arg5: memref<8x4xf32, #tpu.memory_space<vmem>>, %arg6: memref<8x1xf32, #tpu.memory_space<vmem>>, %arg7: memref<1x8xf32, #tpu.memory_space<vmem>>, %arg8: memref<1x1xf32, #tpu.memory_space<vmem>>, %arg9: memref<1x4x256xf32, #tpu.memory_space<vmem>>) attributes {dimension_semantics = [#tpu.dimension_semantics<parallel>, #tpu.dimension_semantics<parallel>], iteration_bounds = array<i64: 2, 1>, scalar_prefetch = 0 : i64, scratch_operands = 0 : i64, tpu.core_type = #tpu.core_type<tc>, window_params = [{transform_indices = @transform_0, window_bounds = array<i64: 1, 4, 256>}, {transform_indices = @transform_1, window_bounds = array<i64: 1, 4, 256>}, {pipeline_mode = #tpu.pipeline_mode<synchronous>, transform_indices = @transform_2, window_bounds = array<i64: 8, 4>}, {pipeline_mode = #tpu.pipeline_mode<synchronous>, transform_indices = @transform_3, window_bounds = array<i64: 8, 4>}, {pipeline_mode = #tpu.pipeline_mode<synchronous>, transform_indices = @transform_4, window_bounds = array<i64: 8, 1>}, {pipeline_mode = #tpu.pipeline_mode<synchronous>, transform_indices = @transform_5, window_bounds = array<i64: 1, 8>}, {pipeline_mode = #tpu.pipeline_mode<synchronous>, transform_indices = @transform_6, window_bounds = array<i64: 1, 1>}, {transform_indices = @transform_7, window_bounds = array<i64: 1, 4, 256>}]} {
    %c0 = arith.constant 0 : index
    %c0_0 = arith.constant 0 : index
    %c0_1 = arith.constant 0 : index
    %0 = vector.load %arg2[%c0, %c0_0, %c0_1] : memref<1x4x256xf32, #tpu.memory_space<vmem>>, vector<1x4x256xf32>
    %1 = vector.shape_cast %0 : vector<1x4x256xf32> to vector<4x256xf32>
    %c0_2 = arith.constant 0 : index
    %c0_3 = arith.constant 0 : index
    %c0_4 = arith.constant 0 : index
    %2 = vector.load %arg3[%c0_2, %c0_3, %c0_4] : memref<1x4x256xf32, #tpu.memory_space<vmem>>, vector<1x4x256xf32>
    %3 = vector.shape_cast %2 : vector<1x4x256xf32> to vector<4x256xf32>
    %c0_5 = arith.constant 0 : index
    %c0_6 = arith.constant 0 : index
    %4 = vector.load %arg4[%c0_5, %c0_6] : memref<8x4xf32, #tpu.memory_space<vmem>>, vector<8x4xf32>
    %cst = arith.constant dense<0.000000e+00> : vector<8x256xf32>
    %5 = tpu.matmul %4, %1, %cst {dimension_numbers = #tpu.dot_dimension_numbers<[1], [0], [0], [1], [0, 0, 1, 1], [], []>} : vector<8x4xf32>, vector<4x256xf32>, vector<8x256xf32> -> vector<8x256xf32>
    %c0_7 = arith.constant 0 : index
    %c0_8 = arith.constant 0 : index
    %6 = vector.load %arg5[%c0_7, %c0_8] : memref<8x4xf32, #tpu.memory_space<vmem>>, vector<8x4xf32>
    %cst_9 = arith.constant dense<0.000000e+00> : vector<8x256xf32>
    %7 = tpu.matmul %6, %3, %cst_9 {dimension_numbers = #tpu.dot_dimension_numbers<[1], [0], [0], [1], [0, 0, 1, 1], [], []>} : vector<8x4xf32>, vector<4x256xf32>, vector<8x256xf32> -> vector<8x256xf32>
    %8 = arith.addf %5, %7 : vector<8x256xf32>
    %c0_10 = arith.constant 0 : index
    %c0_11 = arith.constant 0 : index
    %9 = vector.load %arg6[%c0_10, %c0_11] : memref<8x1xf32, #tpu.memory_space<vmem>>, vector<8x1xf32>
    %10 = vector.broadcast %9 : vector<8x1xf32> to vector<8x256xf32>
    %11 = arith.addf %8, %10 : vector<8x256xf32>
    %cst_12 = arith.constant 0.000000e+00 : f32
    %12 = vector.broadcast %cst_12 : f32 to vector<8x256xf32>
    %13 = arith.maximumf %11, %12 : vector<8x256xf32>
    %c0_13 = arith.constant 0 : index
    %c0_14 = arith.constant 0 : index
    %14 = vector.load %arg7[%c0_13, %c0_14] : memref<1x8xf32, #tpu.memory_space<vmem>>, vector<1x8xf32>
    %cst_15 = arith.constant dense<0.000000e+00> : vector<1x256xf32>
    %15 = tpu.matmul %14, %13, %cst_15 {dimension_numbers = #tpu.dot_dimension_numbers<[1], [0], [0], [1], [0, 0, 1, 1], [], []>} : vector<1x8xf32>, vector<8x256xf32>, vector<1x256xf32> -> vector<1x256xf32>
    %c0_16 = arith.constant 0 : index
    %c0_17 = arith.constant 0 : index
    %16 = vector.load %arg8[%c0_16, %c0_17] : memref<1x1xf32, #tpu.memory_space<vmem>>, vector<1x1xf32>
    %17 = vector.broadcast %16 : vector<1x1xf32> to vector<1x256xf32>
    %18 = arith.addf %15, %17 : vector<1x256xf32>
    %19 = arith.negf %18 : vector<1x256xf32>
    %20 = math.exp %19 : vector<1x256xf32>
    %cst_18 = arith.constant 1.000000e+00 : f32
    %21 = vector.broadcast %cst_18 : f32 to vector<1x256xf32>
    %22 = arith.addf %21, %20 : vector<1x256xf32>
    %23 = arith.divf %21, %22 : vector<1x256xf32>
    %24 = vector.broadcast %23 : vector<1x256xf32> to vector<4x256xf32>
    %25 = arith.mulf %3, %24 : vector<4x256xf32>
    %c0_19 = arith.constant 0 : index
    %c0_20 = arith.constant 0 : index
    %c0_21 = arith.constant 0 : index
    %26 = vector.load %arg9[%c0_19, %c0_20, %c0_21] : memref<1x4x256xf32, #tpu.memory_space<vmem>>, vector<1x4x256xf32>
    %27 = vector.shape_cast %26 : vector<1x4x256xf32> to vector<4x256xf32>
    %28 = vector.shape_cast %25 : vector<4x256xf32> to vector<1x4x256xf32>
    tpu.vector_store %arg9[%c0_19, %c0_20, %c0_21], %28 {strides = array<i32>} : memref<1x4x256xf32, #tpu.memory_space<vmem>>, vector<1x4x256xf32>,
    return
  }
  func.func @transform_0(%arg0: i32, %arg1: i32) -> (i32, i32, i32) {
    %c0_i32 = arith.constant 0 : i32
    %c0_i32_0 = arith.constant 0 : i32
    return %arg0, %c0_i32, %arg1 : i32, i32, i32
  }
  func.func @transform_1(%arg0: i32, %arg1: i32) -> (i32, i32, i32) {
    %c0_i32 = arith.constant 0 : i32
    %c0_i32_0 = arith.constant 0 : i32
    return %arg0, %c0_i32, %arg1 : i32, i32, i32
  }
  func.func @transform_2(%arg0: i32, %arg1: i32) -> (i32, i32) {
    %c0_i32 = arith.constant 0 : i32
    %c0_i32_0 = arith.constant 0 : i32
    %c0_i32_1 = arith.constant 0 : i32
    return %c0_i32, %c0_i32_0 : i32, i32
  }
  func.func @transform_3(%arg0: i32, %arg1: i32) -> (i32, i32) {
    %c0_i32 = arith.constant 0 : i32
    %c0_i32_0 = arith.constant 0 : i32
    %c0_i32_1 = arith.constant 0 : i32
    return %c0_i32, %c0_i32_0 : i32, i32
  }
  func.func @transform_4(%arg0: i32, %arg1: i32) -> (i32, i32) {
    %c0_i32 = arith.constant 0 : i32
    %c0_i32_0 = arith.constant 0 : i32
    %c0_i32_1 = arith.constant 0 : i32
    return %c0_i32, %c0_i32_0 : i32, i32
  }
  func.func @transform_5(%arg0: i32, %arg1: i32) -> (i32, i32) {
    %c0_i32 = arith.constant 0 : i32
    %c0_i32_0 = arith.constant 0 : i32
    %c0_i32_1 = arith.constant 0 : i32
    return %c0_i32, %c0_i32_0 : i32, i32
  }
  func.func @transform_6(%arg0: i32, %arg1: i32) -> (i32, i32) {
    %c0_i32 = arith.constant 0 : i32
    %c0_i32_0 = arith.constant 0 : i32
    %c0_i32_1 = arith.constant 0 : i32
    return %c0_i32, %c0_i32_0 : i32, i32
  }
  func.func @transform_7(%arg0: i32, %arg1: i32) -> (i32, i32, i32) {
    %c0_i32 = arith.constant 0 : i32
    %c0_i32_0 = arith.constant 0 : i32
    return %arg0, %c0_i32, %arg1 : i32, i32, i32
  }
}

</mosaic_0001>

<bundles_post_ra>
// kernel: attention_block.1
= control target key start
LH: loop header
LB: loop body
LE: loop exit
PB: predicated region body
PF: predicated region fallthrough
CT: control target
= control target key end

     0   :  { %s808_s26 = smov 0   ;;  %s810_s27 = smov 0   ;;  %s870_s0 = inlined_call_operand.vmem [shape: f32[2,4,256], index: 0, kind: input, shape index: {}]   ;;  %s871_s1 = inlined_call_operand.vmem [shape: f32[2,4,256], index: 1, kind: input, shape index: {}]   ;;  %s872_s2 = inlined_call_operand.vmem [shape: f32[8,4], index: 2, kind: input, shape index: {}]   ;;  %s873_s3 = inlined_call_operand.vmem [shape: f32[8,4], index: 3, kind: input, shape index: {}]   ;;  %s874_s4 = inlined_call_operand.vmem [shape: f32[8,1], index: 4, kind: input, shape index: {}]   ;;  %s875_s5 = inlined_call_operand.vmem [shape: f32[1,8], index: 5, kind: input, shape index: {}]   ;;  %s876_s6 = inlined_call_operand.<no memory space> [shape: f32[1,1], index: 6, kind: input, shape index: {}]   ;;  %s877_s7 = inlined_call_operand.vmem [shape: f32[2,4,256], index: 7, kind: output, shape index: {}]  }
   0x1   :  { %v12_v0 = vstv %s876_s6  ;;  %s812_s28 = smov 0  }
   0x2   :  { %13 = vst [vmem:[#allocation2] sm:$0x1] %v12_v0 }
   0x3 LB: > { %s31_s6 = sadd.s32 1, %s758_s27  ;;  %p682_p0 = scmp.ge.s32.totalorder %s762_s28, 1  ;;  %s762_s28 = sphi %s812_s28, %s19_s28   ;;  %s758_s27 = sphi %s810_s27, %s879_s27   ;;  %s754_s26 = sphi %s808_s26, %s878_s26  }
   0x4   : > { %p33_p1 = scmp.ge.s32.totalorder %s31_s6, 2  ;;  %p277_p2 = scmp.lt.s32.totalorder %s762_s28, 3 }
   0x6   : > { %s881_s6 = smov (%p33_p1, %s31_s6), 0  ;;  %p278_p3 = pnand %p682_p0, %p277_p2 }
   0x7   : > { %p327_p4 = scmp.lt.s32.totalorder (!%p278_p3), %s754_s26, 1 }
   0x8   : > { %281 = sbr.rel (%p278_p3) target bundleno = 338 (0x152), region = 48 }
   0xd   : > { %v764_v1 = vmov 0   ;;  %v464_v2 = vld [vmem:[%s874_s4] sm:$0xff]  ;;  %s883_s26 = smov (!%p327_p4, %s754_s26), 1  ;;  %v475_v4 = vld [vmem:[#allocation2] sm:$0x1]  ;;  %vm368_vm0 = vcmask 1043456  }
   0xe   : > { %731 = vset.pattern.permute.xlu0 %v764_v1  ;;  %s829_s8 = sshll.u32 %s883_s26, 3  ;;  %v359_v6 = vld [vmem:[%s873_s3] sm:$0xff]  ;;  %vm364_vm1 = vcmask 31744   ;;  %vm482_vm2 = vcmask 64512  }
   0xf   : > { %467 = vperm.xlu0 %731, %v464_v2   ;;  %s344_s11 = scalar_lea.vmem %s871_s1, %s829_s8  ;;  %s334_s14 = scalar_lea.vmem %s870_s0, %s829_s8  ;;  %v358_v9 = vld [vmem:[%s872_s2] sm:$0xff] }
  0x10   : > { %v835_v3 = vld [vmem:[%s344_s11] sm:$0xff]  ;;  %s354_s23 = scalar_lea.vmem %s877_s7, %s829_s8 }
  0x11   : > { %361 = vst [vmem:[#allocation1] ss:$2 sm:$0xff] %v835_v3  ;;  %v356_v5 = vld [vmem:[%s334_s14] sm:$0xff] }
  0x12   : > { %v474_v23 = vld [vmem:[%s875_s5] sm:$0x1] }
  0x17   : > { %478 = vperm.xlu0 %731, %v475_v4  }
  0x18   : > { %v362_v7 = vld.sshfl [vmem:[#allocation1] sm:$0xff pattern:$0x75316420]  ;;  %v363_v8 = vld.sshfl [vmem:[#allocation1 + $0x8] sm:$0xff pattern:$0x75316420] }
  0x19   : > { %414 = vst [vmem:[#allocation1] ss:$2 sm:$0xff] %v356_v5  ;;  %689 = vmatpush.msk.msra.mxu0 %vm368_vm0, %v362_v7  ;;  %691 = vmatpush.msk.msra.mxu1 %vm368_vm0, %v363_v8 }
  0x1a   : > { %690 = vmatmul.msk.f32.vlgmr.msra.gmra.mxu0 %vm364_vm1, %v359_v6  ;;  %692 = vmatmul.msk.f32.vlgmr.msra.gmra.mxu1 %vm364_vm1, %v359_v6 }
  0x20   : > { %v415_v10 = vld.sshfl [vmem:[#allocation1] sm:$0xff pattern:$0x75316420]  ;;  %v416_v11 = vld.sshfl [vmem:[#allocation1 + $0x8] sm:$0xff pattern:$0x75316420] }
  0x21   : > { %693 = vmatpush.msk.msra.mxu2 %vm368_vm0, %v415_v10  ;;  %695 = vmatpush.msk.msra.mxu3 %vm368_vm0, %v416_v11 }
  0x22   : > { %694 = vmatmul.msk.f32.vlgmr.msra.gmra.mxu2 %vm364_vm1, %v358_v9  ;;  %696 = vmatmul.msk.f32.vlgmr.msra.gmra.mxu3 %vm364_vm1, %v358_v9 }
  0x81   : > { %v468_v18 = vpop.permute.xlu0 %467 }
  0x89   : > { %v479_v24 = vpop.permute.xlu0 %478 }
  0x8a   : > { %v481_v25 = vperm.slane %v479_v24, 0 }
  0x97   : > { %v390_v12 = vpop.f32.mrf.mxu0  ;;  %v410_v13 = vpop.f32.mrf.mxu1 }
  0xa5   : > { %v441_v14 = vpop.f32.mrf.mxu2  ;;  %v461_v15 = vpop.f32.mrf.mxu3 }
  0xa6   : > { %v442_v16 = vadd.f32 %v441_v14, %v390_v12  ;;  %v462_v17 = vadd.f32 %v461_v15, %v410_v13 }
  0xa8   : > { %v470_v19 = vadd.f32 %v468_v18, %v442_v16  ;;  %v471_v20 = vadd.f32 %v468_v18, %v462_v17 }
  0xaa   : > { %v472_v21 = vmax.f32 %v470_v19, 0.0  ;;  %v473_v22 = vmax.f32 %v471_v20, 0.0 }
  0xac   : > { %501 = vmatpush.msrb.mxu0 %v472_v21  ;;  %521 = vmatpush.msrb.mxu1 %v473_v22 }
  0xad   : > { %697 = vmatmul.msk.f32.vlgmr.msrb.gmra.mxu0 %vm482_vm2, %v474_v23  ;;  %698 = vmatmul.msk.f32.vlgmr.msrb.gmra.mxu1 %vm482_vm2, %v474_v23 }
 0x12a   : > { %v503_v26 = vpop.f32.mrf.mxu0  ;;  %v523_v27 = vpop.f32.mrf.mxu1 }
 0x12b   : > { %v504_v28 = vadd.f32 %v503_v26, %v481_v25  ;;  %v524_v29 = vadd.f32 %v523_v27, %v481_v25 }
 0x12d   : > { %v699_v30 = vmul.f32 -1.442695, %v504_v28  ;;  %v700_v31 = vmul.f32 -1.442695, %v524_v29 }
 0x12f   : > { %732 = vpow2.f32 %v699_v30 }
 0x130   : > { %734 = vpow2.f32 %v700_v31 }
 0x135   : > { %v733_v32 = vpop.eup %732 }
 0x136   : > { %v735_v33 = vpop.eup %734  ;;  %v532_v34 = vadd.f32 1.0, %v733_v32 }
 0x137   : > { %v533_v35 = vadd.f32 1.0, %v735_v33 }
 0x138   : > { %736 = vrcp.f32 %v532_v34  ;;  %v545_v43 = vand.u32 2147483648, %v532_v34  ;;  %v543_v45 = vand.u32 2147483647, %v532_v34  ;;  %vm539_vm5 = vweird.f32 %v532_v34 }
 0x139   : > { %738 = vrcp.f32 %v533_v35  ;;  %v560_v44 = vand.u32 2147483648, %v533_v35  ;;  %v558_v47 = vand.u32 2147483647, %v533_v35  ;;  %vm554_vm7 = vweird.f32 %v533_v35 }
 0x13a   : > { %v546_v51 = vor.u32 1.1754944e-38, %v545_v43  ;;  %vm544_vm9 = vcmp.eq.f32.partialorder %v543_v45, 8.507059e+37 }
 0x13b   : > { %v561_v52 = vor.u32 1.1754944e-38, %v560_v44  ;;  %vm559_vm10 = vcmp.eq.f32.partialorder %v558_v47, 8.507059e+37 }
 0x13e   : > { %v737_v36 = vpop.eup %736 }
 0x13f   : > { %v739_v37 = vpop.eup %738  ;;  %v535_v38 = vmul.f32 %v737_v36, %v532_v34  ;;  %vm540_vm3 = vweird.f32 %v737_v36 }
 0x140   : > { %v550_v39 = vmul.f32 %v739_v37, %v533_v35  ;;  %vm555_vm4 = vweird.f32 %v739_v37  ;;  %vm541_vm6 = vmor %vm539_vm5, %vm540_vm3 }
 0x141   : > { %v536_v40 = vsub.f32 1.0, %v535_v38  ;;  %vm556_vm8 = vmor %vm554_vm7, %vm555_vm4 }
 0x142   : > { %v551_v41 = vsub.f32 1.0, %v550_v39 }
 0x143   : > { %v537_v42 = vmul.f32 %v737_v36, %v536_v40 }
 0x144   : > { %v552_v46 = vmul.f32 %v739_v37, %v551_v41 }
 0x145   : > { %v538_v48 = vadd.f32 %v737_v36, %v537_v42 }
 0x146   : > { %v553_v49 = vadd.f32 %v739_v37, %v552_v46 }
 0x147   : > { %v542_v50 = vsel %vm541_vm6, %v737_v36, %v538_v48 }
 0x148   : > { %v557_v53 = vsel %vm556_vm8, %v739_v37, %v553_v49  ;;  %v547_v54 = vsel %vm544_vm9, %v546_v51, %v542_v50 }
 0x149   : > { %v562_v55 = vsel %vm559_vm10, %v561_v52, %v557_v53  ;;  %v564_v57 = vperm.slane %v547_v54, 0 }
 0x14a   : > { %v565_v56 = vperm.slane %v562_v55, 0 }
 0x14c   : > { %v568_v58 = vrot.slane %v565_v56, 4 }
 0x14e   : > { %v569_v59 = vsel %vm368_vm0, %v564_v57, %v568_v58 }
 0x14f   : > { %v571_v60 = vmul.f32 %v569_v59, %v835_v3 }
 0x151   : > { %572 = vst [vmem:[%s354_s23] sm:$0xff] %v571_v60 }
 0x152 PF: > { %s19_s28 = sadd.s32 1, %s762_s28   ;;  %s878_s26 = smov %s758_s27 }
 0x153   : > { %p16_p5 = scmp.ge.s32.totalorder %s19_s28, 4   ;;  %s879_s27 = smov %s881_s6 }
 0x155   :  { %18 = sbr.rel (!%p16_p5) target bundleno = 3 (0x3), region = 81 }

</bundles_post_ra>
